<compile_context>
chip_gen: v7x
topology: tpu7x:2x2x1
jax: 0.10.0
libtpu: 0.0.40
codegen_flags: <defaults>
</compile_context>

<pallas_src>
import jax
import jax.numpy as jnp
from jax.experimental import pallas as pl
from jax.experimental.pallas import tpu as pltpu

_LANE = 128          # vreg lane width
_SUB = 8             # f32 vreg sublane count
_SLICE = 16          # rows per fused inner step (2 f32 vregs per map)
_MAX_ROWS = 512      # max rows (of 128 lanes) per grid step


def _cdiv(a, b):
    return -(-a // b)


def _round_up(a, b):
    return _cdiv(a, b) * b


def _east_partial_kernel(gs_ref, ps_ref, rm_ref, gg_ref, pg_ref, acc_ref):
    r = pl.program_id(2)                      # reduction (chunk) axis

    @pl.when(r == 0)
    def _init():
        acc_ref[...] = jnp.zeros_like(acc_ref)

    tr = gs_ref.shape[1]                      # rows in this block (multiple of 8)

    def fold(x):
        # (size, 128) -> (8, 128): static 8-row slices, pure vreg-wise VPU adds
        # (no cross-lane / cross-sublane reduction in the steady state).
        y = x[0:_SUB, :]
        for j in range(_SUB, x.shape[0], _SUB):
            y = y + x[j:j + _SUB, :]
        return y

    zero = jnp.zeros((_SUB, _LANE), jnp.float32)
    acc_gt = zero
    acc_int = zero
    acc_pm = zero
    acc_iou = zero
    acc_ang = zero

    # Fused streaming over 16-row slices keeps the live set ~40 vregs, so the
    # elementwise geo math never spills to VMEM even at tr = 512.
    # TODO(synk): a lax.fori_loop(..., unroll=k) variant would bound live
    # ranges explicitly; the static unroll is simpler and the kernel is
    # HBM-bandwidth-bound on all generations.
    for off in range(0, tr, _SLICE):
        size = min(_SLICE, tr - off)
        sl = slice(off, off + size)

        gs = gs_ref[0, sl, :].astype(jnp.float32)
        ps = ps_ref[0, sl, :].astype(jnp.float32)
        rm = rm_ref[0, sl, :].astype(jnp.float32)
        ps_m = ps * rm

        # geo channels indexed on the leading channel axis: contiguous tiles
        d1_gt = gg_ref[0, 0, sl, :].astype(jnp.float32)
        d2_gt = gg_ref[0, 1, sl, :].astype(jnp.float32)
        d3_gt = gg_ref[0, 2, sl, :].astype(jnp.float32)
        d4_gt = gg_ref[0, 3, sl, :].astype(jnp.float32)
        ang_gt = gg_ref[0, 4, sl, :].astype(jnp.float32)

        d1_p = pg_ref[0, 0, sl, :].astype(jnp.float32)   # pred_geo.type(float32)
        d2_p = pg_ref[0, 1, sl, :].astype(jnp.float32)
        d3_p = pg_ref[0, 2, sl, :].astype(jnp.float32)
        d4_p = pg_ref[0, 3, sl, :].astype(jnp.float32)
        ang_p = pg_ref[0, 4, sl, :].astype(jnp.float32)

        area_gt = (d1_gt + d2_gt) * (d3_gt + d4_gt)
        area_pr = (d1_p + d2_p) * (d3_p + d4_p)
        w_u = jnp.minimum(d3_gt, d3_p) + jnp.minimum(d4_gt, d4_p)
        h_u = jnp.minimum(d1_gt, d1_p) + jnp.minimum(d2_gt, d2_p)
        a_i = w_u * h_u
        a_u = area_gt + area_pr - a_i
        # -log((a_i+1)/(a_u+1)) == log(a_u+1) - log(a_i+1)   (no divide)
        iou_map = jnp.log(a_u + 1.0) - jnp.log(a_i + 1.0)
        ang_map = 1.0 - jnp.cos(ang_p - ang_gt)

        acc_gt = acc_gt + fold(gs)             # sum(gt_score)
        acc_int = acc_int + fold(gs * ps_m)    # dice intersection
        acc_pm = acc_pm + fold(ps_m)           # sum(pred_score * roi_mask)
        acc_iou = acc_iou + fold(iou_map * gs)  # sum(iou_loss_map * gt_score)
        acc_ang = acc_ang + fold(ang_map * gs)  # sum(angle_loss_map * gt_score)

    acc_ref[0, 0, 0, :, :] += acc_gt
    acc_ref[0, 0, 1, :, :] += acc_int
    acc_ref[0, 0, 2, :, :] += acc_pm
    acc_ref[0, 0, 3, :, :] += acc_iou
    acc_ref[0, 0, 4, :, :] += acc_ang


def _tiling(hw):
    """Pick (padded_rows, splits, rows_per_step, chunks) for a flat H*W."""
    rows = _round_up(_cdiv(hw, _LANE), _SUB)      # 128-lane rows, mult of 8
    # 2-way "parallel" row split (keeps both v7x TCs busy even at N=1) when it
    # does not force extra padding beyond the base 8x128 alignment.
    splits = 2 if rows % (2 * _SUB) == 0 else 1
    per = rows // splits                          # rows per split, mult of 8
    chunks = _cdiv(per, _MAX_ROWS)                # grid steps along reduction
    tr = _round_up(_cdiv(per, chunks), _SUB)      # rows per grid step
    rows_padded = splits * chunks * tr
    return rows_padded, splits, tr, chunks


def _to_tiles(x, rows):
    """(N, C, H, W) -> (N, C, rows, 128); copy-free when no pad is needed."""
    n, c, h, w = x.shape
    hw = h * w
    flat = x.reshape(n, c, hw)
    pad = rows * _LANE - hw
    if pad:
        # Zero padding is loss-neutral (every accumulated term carries a factor
        # that is 0 on padded pixels).
        # TODO(synk): for ragged H*W this is an extra HBM read+write pass; an
        # in-kernel ragged-tail mask would avoid it.
        flat = jnp.pad(flat, ((0, 0), (0, 0), (0, pad)))
    return flat.reshape(n, c, rows, _LANE)


@jax.jit
def _east_loss_impl(gt_score, pred_score, gt_geo, pred_geo, roi_mask,
                    weight_angle):
    n, _, h, w = gt_score.shape
    rows, splits, tr, chunks = _tiling(h * w)

    # Inputs keep their storage dtype (bf16/int8 fine); cast happens in-kernel.
    gs = _to_tiles(gt_score, rows)[:, 0]      # (N, rows, 128)
    ps = _to_tiles(pred_score, rows)[:, 0]
    rm = _to_tiles(roi_mask, rows)[:, 0]
    gg = _to_tiles(gt_geo, rows)              # (N, 5, rows, 128)
    pg = _to_tiles(pred_geo, rows)

    score_spec = pl.BlockSpec((1, tr, _LANE),
                              lambda b, s, r: (b, s * chunks + r, 0))
    geo_spec = pl.BlockSpec((1, 5, tr, _LANE),
                            lambda b, s, r: (b, 0, s * chunks + r, 0))

    part = pl.pallas_call(
        _east_partial_kernel,
        out_shape=jax.ShapeDtypeStruct((n, splits, 5, _SUB, _LANE),
                                       jnp.float32),
        grid=(n, splits, chunks),
        in_specs=[score_spec, score_spec, score_spec, geo_spec, geo_spec],
        out_specs=pl.BlockSpec((1, 1, 5, _SUB, _LANE),
                               lambda b, s, r: (b, s, 0, 0, 0)),
        compiler_params=pltpu.CompilerParams(
            dimension_semantics=("parallel", "parallel", "arbitrary"),
            vmem_limit_bytes=32 * 1024 * 1024),
    )(gs, ps, rm, gg, pg)

    # tiny final reduce (N * splits * 5 * 1024 floats) in XLA
    sums = jnp.sum(part, axis=(0, 1, 3, 4))
    sum_gt, inter, sum_pm, sum_iou_gt, sum_ang_gt = (sums[i] for i in range(5))

    valid = sum_gt >= 1.0
    safe_gt = jnp.where(valid, sum_gt, 1.0)
    classify_loss = 1.0 - 2.0 * inter / (safe_gt + sum_pm + 1e-5)
    angle_loss = weight_angle * sum_ang_gt / safe_gt
    iou_loss = sum_iou_gt / (safe_gt + 1e-6)
    total = jnp.where(valid, classify_loss + angle_loss + iou_loss,
                      jnp.float32(0.0))
    return total, classify_loss, angle_loss, iou_loss, valid


def east_loss(gt_score, pred_score, gt_geo, pred_geo, roi_mask,
              weight_angle=10.0):
    """Mirror of EASTLoss.forward (PyTorch NCHW inputs), fully on-device."""
    total, cls_l, ang_l, iou_l, valid = _east_loss_impl(
        gt_score, pred_score, gt_geo, pred_geo, roi_mask,
        jnp.float32(weight_angle))
    # TODO(synk): PyTorch returns dict(cls_loss=None, ...) when sum(gt_score) < 1;
    # to stay jittable (no host sync) we return device scalars plus `valid`.
    return total, dict(cls_loss=cls_l, angle_loss=ang_l, iou_loss=iou_l,
                       valid=valid)


def _reference(gt_score, pred_score, gt_geo, pred_geo, roi_mask,
               weight_angle=10.0):
    """Pure-JAX reference for correctness check (mirrors the PyTorch code)."""
    if float(jnp.sum(gt_score)) < 1.0:
        return 0.0
    inter = jnp.sum(gt_score * pred_score * roi_mask)
    union = jnp.sum(gt_score) + jnp.sum(pred_score * roi_mask) + 1e-5
    classify_loss = 1.0 - 2.0 * inter / union
    d1g, d2g, d3g, d4g, ag = jnp.split(gt_geo, 5, axis=1)
    d1p, d2p, d3p, d4p, ap = jnp.split(pred_geo.astype(jnp.float32), 5, axis=1)
    area_gt = (d1g + d2g) * (d3g + d4g)
    area_pr = (d1p + d2p) * (d3p + d4p)
    w_u = jnp.minimum(d3g, d3p) + jnp.minimum(d4g, d4p)
    h_u = jnp.minimum(d1g, d1p) + jnp.minimum(d2g, d2p)
    a_i = w_u * h_u
    a_u = area_gt + area_pr - a_i
    iou_map = -jnp.log((a_i + 1.0) / (a_u + 1.0))
    ang_map = 1.0 - jnp.cos(ap - ag)
    angle_loss = weight_angle * jnp.sum(ang_map * gt_score) / jnp.sum(gt_score)
    iou_loss = jnp.sum(iou_map * gt_score) / (jnp.sum(gt_score) + 1e-6)
    return float(classify_loss + angle_loss + iou_loss)


def _make_inputs(key, n, h, w):
    k1, k2, k3, k4, k5 = jax.random.split(key, 5)
    gt_score = (jax.random.uniform(k1, (n, 1, h, w)) > 0.6).astype(jnp.float32)
    pred_score = jax.nn.sigmoid(jax.random.normal(k2, (n, 1, h, w)))
    gt_geo = jnp.concatenate(
        [jax.random.uniform(k3, (n, 4, h, w)) * 10.0,
         (jax.random.uniform(k3, (n, 1, h, w)) - 0.5) * 0.8], axis=1)
    pred_geo = jnp.concatenate(
        [jax.random.uniform(k4, (n, 4, h, w)) * 10.0,
         (jax.random.uniform(k4, (n, 1, h, w)) - 0.5) * 0.8], axis=1)
    roi_mask = (jax.random.uniform(k5, (n, 1, h, w)) > 0.2).astype(jnp.float32)
    return gt_score, pred_score, gt_geo, pred_geo, roi_mask


if __name__ == "__main__":
    key = jax.random.PRNGKey(0)
    k_small, k_big = jax.random.split(key)

    # 1) small ragged case (padding path), N=2, 16x16
    gt_s, pr_s, gt_g, pr_g, roi = _make_inputs(k_small, 2, 16, 16)
    total, parts = east_loss(gt_s, pr_s, gt_g, pr_g, roi)
    total = jax.block_until_ready(total)
    ref = _reference(gt_s, pr_s, gt_g, pr_g, roi)
    assert abs(float(total) - ref) < 1e-3, (float(total), ref)

    # 2) aligned case (copy-free reshape, 2-way row split), N=1, 128x128
    gt_s2, pr_s2, gt_g2, pr_g2, roi2 = _make_inputs(k_big, 1, 128, 128)
    total2, _ = east_loss(gt_s2, pr_s2, gt_g2, pr_g2, roi2)
    total2 = jax.block_until_ready(total2)
    ref2 = _reference(gt_s2, pr_s2, gt_g2, pr_g2, roi2)
    assert abs(float(total2) - ref2) < 2e-3, (float(total2), ref2)

    # 3) empty-gt branch (total must be exactly 0)
    zero_total, _ = east_loss(jnp.zeros_like(gt_s), pr_s, gt_g, pr_g, roi)
    zero_total = jax.block_until_ready(zero_total)
    assert float(zero_total) == 0.0

    print("KERNEL_OK")
</pallas_src>

<mosaic_0001>
module attributes {stable_mosaic.version = 11 : i64} {
  func.func @_east_partial_kernel(%arg0: i32, %arg1: i32, %arg2: i32, %arg3: memref<1x8x128xf32, #tpu.memory_space<vmem>>, %arg4: memref<1x8x128xf32, #tpu.memory_space<vmem>>, %arg5: memref<1x8x128xf32, #tpu.memory_space<vmem>>, %arg6: memref<1x5x8x128xf32, #tpu.memory_space<vmem>>, %arg7: memref<1x5x8x128xf32, #tpu.memory_space<vmem>>, %arg8: memref<1x1x5x8x128xf32, #tpu.memory_space<vmem>>) attributes {dimension_semantics = [#tpu.dimension_semantics<parallel>, #tpu.dimension_semantics<parallel>, #tpu.dimension_semantics<arbitrary>], iteration_bounds = array<i64: 2, 1, 1>, scalar_prefetch = 0 : i64, scratch_operands = 0 : i64, tpu.core_type = #tpu.core_type<tc>, window_params = [{transform_indices = @transform_0, window_bounds = array<i64: 1, 8, 128>}, {transform_indices = @transform_1, window_bounds = array<i64: 1, 8, 128>}, {transform_indices = @transform_2, window_bounds = array<i64: 1, 8, 128>}, {transform_indices = @transform_3, window_bounds = array<i64: 1, 5, 8, 128>}, {transform_indices = @transform_4, window_bounds = array<i64: 1, 5, 8, 128>}, {transform_indices = @transform_5, window_bounds = array<i64: 1, 1, 5, 8, 128>}]} {
    %c0_i32 = arith.constant 0 : i32
    %0 = arith.cmpi eq, %arg2, %c0_i32 : i32
    %1 = arith.extui %0 : i1 to i32
    %c0_i32_0 = arith.constant 0 : i32
    %2 = arith.cmpi ne, %1, %c0_i32_0 : i32
    scf.if %2 {
      %cst_98 = arith.constant 0.000000e+00 : f32
      %95 = vector.broadcast %cst_98 : f32 to vector<1x1x5x8x128xf32>
      %c0_99 = arith.constant 0 : index
      %c0_100 = arith.constant 0 : index
      %c0_101 = arith.constant 0 : index
      %c0_102 = arith.constant 0 : index
      %c0_103 = arith.constant 0 : index
      %96 = vector.load %arg8[%c0_99, %c0_100, %c0_101, %c0_102, %c0_103] : memref<1x1x5x8x128xf32, #tpu.memory_space<vmem>>, vector<1x1x5x8x128xf32>
      tpu.vector_store %arg8[%c0_99, %c0_100, %c0_101, %c0_102, %c0_103], %95 {strides = array<i32>} : memref<1x1x5x8x128xf32, #tpu.memory_space<vmem>>, vector<1x1x5x8x128xf32>,
    } else {
    }
    %cst = arith.constant 0.000000e+00 : f32
    %3 = vector.broadcast %cst : f32 to vector<8x128xf32>
    %c0 = arith.constant 0 : index
    %c0_1 = arith.constant 0 : index
    %c0_2 = arith.constant 0 : index
    %4 = vector.load %arg3[%c0, %c0_1, %c0_2] : memref<1x8x128xf32, #tpu.memory_space<vmem>>, vector<1x8x128xf32>
    %5 = vector.shape_cast %4 : vector<1x8x128xf32> to vector<8x128xf32>
    %c0_3 = arith.constant 0 : index
    %c0_4 = arith.constant 0 : index
    %c0_5 = arith.constant 0 : index
    %6 = vector.load %arg4[%c0_3, %c0_4, %c0_5] : memref<1x8x128xf32, #tpu.memory_space<vmem>>, vector<1x8x128xf32>
    %7 = vector.shape_cast %6 : vector<1x8x128xf32> to vector<8x128xf32>
    %c0_6 = arith.constant 0 : index
    %c0_7 = arith.constant 0 : index
    %c0_8 = arith.constant 0 : index
    %8 = vector.load %arg5[%c0_6, %c0_7, %c0_8] : memref<1x8x128xf32, #tpu.memory_space<vmem>>, vector<1x8x128xf32>
    %9 = vector.shape_cast %8 : vector<1x8x128xf32> to vector<8x128xf32>
    %10 = arith.mulf %7, %9 : vector<8x128xf32>
    %c0_9 = arith.constant 0 : index
    %c0_10 = arith.constant 0 : index
    %c0_11 = arith.constant 0 : index
    %c0_12 = arith.constant 0 : index
    %11 = vector.load %arg6[%c0_9, %c0_10, %c0_11, %c0_12] : memref<1x5x8x128xf32, #tpu.memory_space<vmem>>, vector<1x1x8x128xf32>
    %12 = vector.shape_cast %11 : vector<1x1x8x128xf32> to vector<8x128xf32>
    %c0_13 = arith.constant 0 : index
    %c1 = arith.constant 1 : index
    %c0_14 = arith.constant 0 : index
    %c0_15 = arith.constant 0 : index
    %13 = vector.load %arg6[%c0_13, %c1, %c0_14, %c0_15] : memref<1x5x8x128xf32, #tpu.memory_space<vmem>>, vector<1x1x8x128xf32>
    %14 = vector.shape_cast %13 : vector<1x1x8x128xf32> to vector<8x128xf32>
    %c0_16 = arith.constant 0 : index
    %c2 = arith.constant 2 : index
    %c0_17 = arith.constant 0 : index
    %c0_18 = arith.constant 0 : index
    %15 = vector.load %arg6[%c0_16, %c2, %c0_17, %c0_18] : memref<1x5x8x128xf32, #tpu.memory_space<vmem>>, vector<1x1x8x128xf32>
    %16 = vector.shape_cast %15 : vector<1x1x8x128xf32> to vector<8x128xf32>
    %c0_19 = arith.constant 0 : index
    %c3 = arith.constant 3 : index
    %c0_20 = arith.constant 0 : index
    %c0_21 = arith.constant 0 : index
    %17 = vector.load %arg6[%c0_19, %c3, %c0_20, %c0_21] : memref<1x5x8x128xf32, #tpu.memory_space<vmem>>, vector<1x1x8x128xf32>
    %18 = vector.shape_cast %17 : vector<1x1x8x128xf32> to vector<8x128xf32>
    %c0_22 = arith.constant 0 : index
    %c4 = arith.constant 4 : index
    %c0_23 = arith.constant 0 : index
    %c0_24 = arith.constant 0 : index
    %19 = vector.load %arg6[%c0_22, %c4, %c0_23, %c0_24] : memref<1x5x8x128xf32, #tpu.memory_space<vmem>>, vector<1x1x8x128xf32>
    %20 = vector.shape_cast %19 : vector<1x1x8x128xf32> to vector<8x128xf32>
    %c0_25 = arith.constant 0 : index
    %c0_26 = arith.constant 0 : index
    %c0_27 = arith.constant 0 : index
    %c0_28 = arith.constant 0 : index
    %21 = vector.load %arg7[%c0_25, %c0_26, %c0_27, %c0_28] : memref<1x5x8x128xf32, #tpu.memory_space<vmem>>, vector<1x1x8x128xf32>
    %22 = vector.shape_cast %21 : vector<1x1x8x128xf32> to vector<8x128xf32>
    %c0_29 = arith.constant 0 : index
    %c1_30 = arith.constant 1 : index
    %c0_31 = arith.constant 0 : index
    %c0_32 = arith.constant 0 : index
    %23 = vector.load %arg7[%c0_29, %c1_30, %c0_31, %c0_32] : memref<1x5x8x128xf32, #tpu.memory_space<vmem>>, vector<1x1x8x128xf32>
    %24 = vector.shape_cast %23 : vector<1x1x8x128xf32> to vector<8x128xf32>
    %c0_33 = arith.constant 0 : index
    %c2_34 = arith.constant 2 : index
    %c0_35 = arith.constant 0 : index
    %c0_36 = arith.constant 0 : index
    %25 = vector.load %arg7[%c0_33, %c2_34, %c0_35, %c0_36] : memref<1x5x8x128xf32, #tpu.memory_space<vmem>>, vector<1x1x8x128xf32>
    %26 = vector.shape_cast %25 : vector<1x1x8x128xf32> to vector<8x128xf32>
    %c0_37 = arith.constant 0 : index
    %c3_38 = arith.constant 3 : index
    %c0_39 = arith.constant 0 : index
    %c0_40 = arith.constant 0 : index
    %27 = vector.load %arg7[%c0_37, %c3_38, %c0_39, %c0_40] : memref<1x5x8x128xf32, #tpu.memory_space<vmem>>, vector<1x1x8x128xf32>
    %28 = vector.shape_cast %27 : vector<1x1x8x128xf32> to vector<8x128xf32>
    %c0_41 = arith.constant 0 : index
    %c4_42 = arith.constant 4 : index
    %c0_43 = arith.constant 0 : index
    %c0_44 = arith.constant 0 : index
    %29 = vector.load %arg7[%c0_41, %c4_42, %c0_43, %c0_44] : memref<1x5x8x128xf32, #tpu.memory_space<vmem>>, vector<1x1x8x128xf32>
    %30 = vector.shape_cast %29 : vector<1x1x8x128xf32> to vector<8x128xf32>
    %31 = arith.addf %12, %14 : vector<8x128xf32>
    %32 = arith.addf %16, %18 : vector<8x128xf32>
    %33 = arith.mulf %31, %32 : vector<8x128xf32>
    %34 = arith.addf %22, %24 : vector<8x128xf32>
    %35 = arith.addf %26, %28 : vector<8x128xf32>
    %36 = arith.mulf %34, %35 : vector<8x128xf32>
    %37 = arith.minimumf %16, %26 : vector<8x128xf32>
    %38 = arith.minimumf %18, %28 : vector<8x128xf32>
    %39 = arith.addf %37, %38 : vector<8x128xf32>
    %40 = arith.minimumf %12, %22 : vector<8x128xf32>
    %41 = arith.minimumf %14, %24 : vector<8x128xf32>
    %42 = arith.addf %40, %41 : vector<8x128xf32>
    %43 = arith.mulf %39, %42 : vector<8x128xf32>
    %44 = arith.addf %33, %36 : vector<8x128xf32>
    %45 = arith.subf %44, %43 : vector<8x128xf32>
    %cst_45 = arith.constant 1.000000e+00 : f32
    %46 = vector.broadcast %cst_45 : f32 to vector<8x128xf32>
    %47 = arith.addf %45, %46 : vector<8x128xf32>
    %48 = math.log %47 : vector<8x128xf32>
    %cst_46 = arith.constant 1.000000e+00 : f32
    %49 = vector.broadcast %cst_46 : f32 to vector<8x128xf32>
    %50 = arith.addf %43, %49 : vector<8x128xf32>
    %51 = math.log %50 : vector<8x128xf32>
    %52 = arith.subf %48, %51 : vector<8x128xf32>
    %53 = arith.subf %30, %20 : vector<8x128xf32>
    %54 = math.cos %53 : vector<8x128xf32>
    %cst_47 = arith.constant 1.000000e+00 : f32
    %55 = vector.broadcast %cst_47 : f32 to vector<8x128xf32>
    %56 = arith.subf %55, %54 : vector<8x128xf32>
    %57 = arith.addf %3, %5 : vector<8x128xf32>
    %58 = arith.mulf %5, %10 : vector<8x128xf32>
    %59 = arith.addf %3, %58 : vector<8x128xf32>
    %60 = arith.addf %3, %10 : vector<8x128xf32>
    %61 = arith.mulf %52, %5 : vector<8x128xf32>
    %62 = arith.addf %3, %61 : vector<8x128xf32>
    %63 = arith.mulf %56, %5 : vector<8x128xf32>
    %64 = arith.addf %3, %63 : vector<8x128xf32>
    %c0_48 = arith.constant 0 : index
    %c0_49 = arith.constant 0 : index
    %c0_50 = arith.constant 0 : index
    %c0_51 = arith.constant 0 : index
    %c0_52 = arith.constant 0 : index
    %65 = vector.load %arg8[%c0_48, %c0_49, %c0_50, %c0_51, %c0_52] : memref<1x1x5x8x128xf32, #tpu.memory_space<vmem>>, vector<1x1x1x8x128xf32>
    %66 = vector.shape_cast %65 : vector<1x1x1x8x128xf32> to vector<8x128xf32>
    %67 = arith.addf %66, %57 : vector<8x128xf32>
    %c0_53 = arith.constant 0 : index
    %c0_54 = arith.constant 0 : index
    %c0_55 = arith.constant 0 : index
    %c0_56 = arith.constant 0 : index
    %c0_57 = arith.constant 0 : index
    %68 = vector.load %arg8[%c0_53, %c0_54, %c0_55, %c0_56, %c0_57] : memref<1x1x5x8x128xf32, #tpu.memory_space<vmem>>, vector<1x1x1x8x128xf32>
    %69 = vector.shape_cast %68 : vector<1x1x1x8x128xf32> to vector<8x128xf32>
    %70 = vector.shape_cast %67 : vector<8x128xf32> to vector<1x1x1x8x128xf32>
    tpu.vector_store %arg8[%c0_53, %c0_54, %c0_55, %c0_56, %c0_57], %70 {strides = array<i32>} : memref<1x1x5x8x128xf32, #tpu.memory_space<vmem>>, vector<1x1x1x8x128xf32>,
    %c0_58 = arith.constant 0 : index
    %c0_59 = arith.constant 0 : index
    %c1_60 = arith.constant 1 : index
    %c0_61 = arith.constant 0 : index
    %c0_62 = arith.constant 0 : index
    %71 = vector.load %arg8[%c0_58, %c0_59, %c1_60, %c0_61, %c0_62] : memref<1x1x5x8x128xf32, #tpu.memory_space<vmem>>, vector<1x1x1x8x128xf32>
    %72 = vector.shape_cast %71 : vector<1x1x1x8x128xf32> to vector<8x128xf32>
    %73 = arith.addf %72, %59 : vector<8x128xf32>
    %c0_63 = arith.constant 0 : index
    %c0_64 = arith.constant 0 : index
    %c1_65 = arith.constant 1 : index
    %c0_66 = arith.constant 0 : index
    %c0_67 = arith.constant 0 : index
    %74 = vector.load %arg8[%c0_63, %c0_64, %c1_65, %c0_66, %c0_67] : memref<1x1x5x8x128xf32, #tpu.memory_space<vmem>>, vector<1x1x1x8x128xf32>
    %75 = vector.shape_cast %74 : vector<1x1x1x8x128xf32> to vector<8x128xf32>
    %76 = vector.shape_cast %73 : vector<8x128xf32> to vector<1x1x1x8x128xf32>
    tpu.vector_store %arg8[%c0_63, %c0_64, %c1_65, %c0_66, %c0_67], %76 {strides = array<i32>} : memref<1x1x5x8x128xf32, #tpu.memory_space<vmem>>, vector<1x1x1x8x128xf32>,
    %c0_68 = arith.constant 0 : index
    %c0_69 = arith.constant 0 : index
    %c2_70 = arith.constant 2 : index
    %c0_71 = arith.constant 0 : index
    %c0_72 = arith.constant 0 : index
    %77 = vector.load %arg8[%c0_68, %c0_69, %c2_70, %c0_71, %c0_72] : memref<1x1x5x8x128xf32, #tpu.memory_space<vmem>>, vector<1x1x1x8x128xf32>
    %78 = vector.shape_cast %77 : vector<1x1x1x8x128xf32> to vector<8x128xf32>
    %79 = arith.addf %78, %60 : vector<8x128xf32>
    %c0_73 = arith.constant 0 : index
    %c0_74 = arith.constant 0 : index
    %c2_75 = arith.constant 2 : index
    %c0_76 = arith.constant 0 : index
    %c0_77 = arith.constant 0 : index
    %80 = vector.load %arg8[%c0_73, %c0_74, %c2_75, %c0_76, %c0_77] : memref<1x1x5x8x128xf32, #tpu.memory_space<vmem>>, vector<1x1x1x8x128xf32>
    %81 = vector.shape_cast %80 : vector<1x1x1x8x128xf32> to vector<8x128xf32>
    %82 = vector.shape_cast %79 : vector<8x128xf32> to vector<1x1x1x8x128xf32>
    tpu.vector_store %arg8[%c0_73, %c0_74, %c2_75, %c0_76, %c0_77], %82 {strides = array<i32>} : memref<1x1x5x8x128xf32, #tpu.memory_space<vmem>>, vector<1x1x1x8x128xf32>,
    %c0_78 = arith.constant 0 : index
    %c0_79 = arith.constant 0 : index
    %c3_80 = arith.constant 3 : index
    %c0_81 = arith.constant 0 : index
    %c0_82 = arith.constant 0 : index
    %83 = vector.load %arg8[%c0_78, %c0_79, %c3_80, %c0_81, %c0_82] : memref<1x1x5x8x128xf32, #tpu.memory_space<vmem>>, vector<1x1x1x8x128xf32>
    %84 = vector.shape_cast %83 : vector<1x1x1x8x128xf32> to vector<8x128xf32>
    %85 = arith.addf %84, %62 : vector<8x128xf32>
    %c0_83 = arith.constant 0 : index
    %c0_84 = arith.constant 0 : index
    %c3_85 = arith.constant 3 : index
    %c0_86 = arith.constant 0 : index
    %c0_87 = arith.constant 0 : index
    %86 = vector.load %arg8[%c0_83, %c0_84, %c3_85, %c0_86, %c0_87] : memref<1x1x5x8x128xf32, #tpu.memory_space<vmem>>, vector<1x1x1x8x128xf32>
    %87 = vector.shape_cast %86 : vector<1x1x1x8x128xf32> to vector<8x128xf32>
    %88 = vector.shape_cast %85 : vector<8x128xf32> to vector<1x1x1x8x128xf32>
    tpu.vector_store %arg8[%c0_83, %c0_84, %c3_85, %c0_86, %c0_87], %88 {strides = array<i32>} : memref<1x1x5x8x128xf32, #tpu.memory_space<vmem>>, vector<1x1x1x8x128xf32>,
    %c0_88 = arith.constant 0 : index
    %c0_89 = arith.constant 0 : index
    %c4_90 = arith.constant 4 : index
    %c0_91 = arith.constant 0 : index
    %c0_92 = arith.constant 0 : index
    %89 = vector.load %arg8[%c0_88, %c0_89, %c4_90, %c0_91, %c0_92] : memref<1x1x5x8x128xf32, #tpu.memory_space<vmem>>, vector<1x1x1x8x128xf32>
    %90 = vector.shape_cast %89 : vector<1x1x1x8x128xf32> to vector<8x128xf32>
    %91 = arith.addf %90, %64 : vector<8x128xf32>
    %c0_93 = arith.constant 0 : index
    %c0_94 = arith.constant 0 : index
    %c4_95 = arith.constant 4 : index
    %c0_96 = arith.constant 0 : index
    %c0_97 = arith.constant 0 : index
    %92 = vector.load %arg8[%c0_93, %c0_94, %c4_95, %c0_96, %c0_97] : memref<1x1x5x8x128xf32, #tpu.memory_space<vmem>>, vector<1x1x1x8x128xf32>
    %93 = vector.shape_cast %92 : vector<1x1x1x8x128xf32> to vector<8x128xf32>
    %94 = vector.shape_cast %91 : vector<8x128xf32> to vector<1x1x1x8x128xf32>
    tpu.vector_store %arg8[%c0_93, %c0_94, %c4_95, %c0_96, %c0_97], %94 {strides = array<i32>} : memref<1x1x5x8x128xf32, #tpu.memory_space<vmem>>, vector<1x1x1x8x128xf32>,
    return
  }
  func.func @transform_0(%arg0: i32, %arg1: i32, %arg2: i32) -> (i32, i32, i32) {
    %c1_i32 = arith.constant 1 : i32
    %0 = arith.muli %arg1, %c1_i32 : i32
    %1 = arith.addi %0, %arg2 : i32
    %c0_i32 = arith.constant 0 : i32
    %c0_i32_0 = arith.constant 0 : i32
    return %arg0, %1, %c0_i32 : i32, i32, i32
  }
  func.func @transform_1(%arg0: i32, %arg1: i32, %arg2: i32) -> (i32, i32, i32) {
    %c1_i32 = arith.constant 1 : i32
    %0 = arith.muli %arg1, %c1_i32 : i32
    %1 = arith.addi %0, %arg2 : i32
    %c0_i32 = arith.constant 0 : i32
    %c0_i32_0 = arith.constant 0 : i32
    return %arg0, %1, %c0_i32 : i32, i32, i32
  }
  func.func @transform_2(%arg0: i32, %arg1: i32, %arg2: i32) -> (i32, i32, i32) {
    %c1_i32 = arith.constant 1 : i32
    %0 = arith.muli %arg1, %c1_i32 : i32
    %1 = arith.addi %0, %arg2 : i32
    %c0_i32 = arith.constant 0 : i32
    %c0_i32_0 = arith.constant 0 : i32
    return %arg0, %1, %c0_i32 : i32, i32, i32
  }
  func.func @transform_3(%arg0: i32, %arg1: i32, %arg2: i32) -> (i32, i32, i32, i32) {
    %c1_i32 = arith.constant 1 : i32
    %0 = arith.muli %arg1, %c1_i32 : i32
    %1 = arith.addi %0, %arg2 : i32
    %c0_i32 = arith.constant 0 : i32
    %c0_i32_0 = arith.constant 0 : i32
    %c0_i32_1 = arith.constant 0 : i32
    return %arg0, %c0_i32, %1, %c0_i32_0 : i32, i32, i32, i32
  }
  func.func @transform_4(%arg0: i32, %arg1: i32, %arg2: i32) -> (i32, i32, i32, i32) {
    %c1_i32 = arith.constant 1 : i32
    %0 = arith.muli %arg1, %c1_i32 : i32
    %1 = arith.addi %0, %arg2 : i32
    %c0_i32 = arith.constant 0 : i32
    %c0_i32_0 = arith.constant 0 : i32
    %c0_i32_1 = arith.constant 0 : i32
    return %arg0, %c0_i32, %1, %c0_i32_0 : i32, i32, i32, i32
  }
  func.func @transform_5(%arg0: i32, %arg1: i32, %arg2: i32) -> (i32, i32, i32, i32, i32) {
    %c0_i32 = arith.constant 0 : i32
    %c0_i32_0 = arith.constant 0 : i32
    %c0_i32_1 = arith.constant 0 : i32
    %c0_i32_2 = arith.constant 0 : i32
    return %arg0, %arg1, %c0_i32, %c0_i32_0, %c0_i32_1 : i32, i32, i32, i32, i32
  }
}

</mosaic_0001>

<bundles_post_ra>
// kernel: _east_loss_impl.1
= control target key start
LH: loop header
LB: loop body
LE: loop exit
PB: predicated region body
PF: predicated region fallthrough
CT: control target
= control target key end

     0   :  { %s892_s18 = smov 0   ;;  %s894_s19 = smov 0   ;;  %s974_s0 = inlined_call_operand.vmem [shape: f32[2,8,128], index: 0, kind: input, shape index: {}]   ;;  %s975_s1 = inlined_call_operand.vmem [shape: f32[2,8,128], index: 1, kind: input, shape index: {}]   ;;  %s976_s2 = inlined_call_operand.vmem [shape: f32[2,8,128], index: 2, kind: input, shape index: {}]   ;;  %s977_s3 = inlined_call_operand.vmem [shape: f32[2,5,8,128], index: 3, kind: input, shape index: {}]   ;;  %s978_s4 = inlined_call_operand.vmem [shape: f32[2,5,8,128], index: 4, kind: input, shape index: {}]   ;;  %s979_s5 = inlined_call_operand.vmem [shape: f32[2,1,5,8,128], index: 5, kind: output, shape index: {}]  }
   0x1   :  { %s896_s20 = smov 0  }
   0x2 LB: > { %s34_s21 = sadd.s32 1, %s850_s19  ;;  %p759_p0 = scmp.ge.s32.totalorder %s854_s20, 1  ;;  %s854_s20 = sphi %s896_s20, %s15_s20   ;;  %s850_s19 = sphi %s894_s19, %s981_s19   ;;  %s846_s18 = sphi %s892_s18, %s980_s18  }
   0x3   : > { %p36_p1 = scmp.ge.s32.totalorder %s34_s21, 2  ;;  %p290_p2 = scmp.lt.s32.totalorder %s854_s20, 3 }
   0x5   : > { %s983_s21 = smov (%p36_p1, %s34_s21), 0  ;;  %p291_p3 = pnand %p759_p0, %p290_p2 }
   0x6   : > { %p360_p4 = scmp.lt.s32.totalorder (!%p291_p3), %s846_s18, 1  ;;  %v856_v44 = vmov (!%p291_p3), 683565275   ;;  %v857_v46 = vmov (!%p291_p3), 2475754826  }
   0x7   : > { %294 = sbr.rel (%p291_p3) target bundleno = 111 (0x6f), region = 40  ;;  %v858_v48 = vmov (!%p291_p3), 2131351028   ;;  %v859_v50 = vmov (!%p291_p3), 2102212464  }
   0x8   : > { %v860_v52 = vmov (!%p291_p3), 920167782   ;;  %v861_v60 = vmov (!%p291_p3), 1326507024  }
   0xe   : > { %s985_s18 = smov (!%p360_p4, %s846_s18), 1 }
   0xf   : > { %s788_s22 = smul.u32 40, %s985_s18  ;;  %s760_s23 = sshll.u32 %s985_s18, 3 }
  0x10   : > { %s366_s26 = scalar_lea.vmem %s974_s0, %s760_s23  ;;  %s375_s29 = scalar_lea.vmem %s975_s1, %s760_s23 }
  0x11   : > { %s919_s7 = scalar_lea.vmem %s979_s5, %s788_s22  ;;  %v921_v0 = vld [vmem:[%s366_s26] sm:$0xff]  ;;  %s384_s10 = scalar_lea.vmem %s976_s2, %s760_s23 }
  0x12   : > { %v425_v1 = vld [vmem:[%s375_s29] sm:$0xff]  ;;  %s394_s13 = scalar_lea.vmem %s977_s3, %s788_s22  ;;  %s404_s16 = scalar_lea.vmem %s978_s4, %s788_s22  ;;  %583 = vst [vmem:[%s919_s7] sm:$0xff] %v921_v0 }
  0x13   : > { %v426_v2 = vld [vmem:[%s384_s10] sm:$0xff]  ;;  %v766_v5 = vld [vmem:[%s394_s13 + $0x8] sm:$0xff]  ;;  %v767_v6 = vld [vmem:[%s394_s13 + $0x10] sm:$0xff] }
  0x14   : > { %v427_v3 = vmul.f32 %v426_v2, %v425_v1  ;;  %v428_v4 = vld [vmem:[%s394_s13] sm:$0xff]  ;;  %v768_v7 = vld [vmem:[%s394_s13 + $0x18] sm:$0xff]  ;;  %v770_v9 = vld [vmem:[%s404_s16 + $0x8] sm:$0xff] }
  0x15   : > { %v437_v8 = vld [vmem:[%s404_s16] sm:$0xff]  ;;  %v446_v10 = vadd.f32 %v766_v5, %v428_v4  ;;  %v771_v12 = vld [vmem:[%s404_s16 + $0x10] sm:$0xff]  ;;  %v772_v13 = vld [vmem:[%s404_s16 + $0x18] sm:$0xff]  ;;  %v447_v14 = vadd.f32 %v768_v7, %v767_v6  ;;  %v456_v23 = vmin.f32 %v766_v5, %v770_v9 }
  0x16   : > { %v574_v11 = vmul.f32 %v427_v3, %v921_v0  ;;  %v449_v15 = vadd.f32 %v770_v9, %v437_v8  ;;  %v769_v16 = vld [vmem:[%s394_s13 + $0x20] sm:$0xff]  ;;  %v450_v17 = vadd.f32 %v772_v13, %v771_v12  ;;  %v452_v18 = vmin.f32 %v767_v6, %v771_v12  ;;  %781 = vst [vmem:[%s919_s7 + $0x10] sm:$0xff] %v427_v3 }
  0x17   : > { %v453_v19 = vmin.f32 %v768_v7, %v772_v13  ;;  %v455_v20 = vmin.f32 %v428_v4, %v437_v8  ;;  %v773_v21 = vld [vmem:[%s404_s16 + $0x20] sm:$0xff]  ;;  %v448_v22 = vmul.f32 %v447_v14, %v446_v10 }
  0x18   : > { %v936_v24 = vsub.f32 %v773_v21, %v769_v16  ;;  %v451_v25 = vmul.f32 %v450_v17, %v449_v15  ;;  %779 = vst [vmem:[%s919_s7 + $0x8] sm:$0xff] %v574_v11 }
  0x19   : > { %v454_v26 = vadd.f32 %v453_v19, %v452_v18  ;;  %v457_v27 = vadd.f32 %v456_v23, %v455_v20 }
  0x1a   : > { %v472_v28 = vand.u32 2139095040, %v936_v24  ;;  %v459_v29 = vadd.f32 %v451_v25, %v448_v22  ;;  %v469_v30 = vand.u32 2147483647, %v936_v24  ;;  %vm471_vm7 = vcmp.lt.s32.totalorder %v936_v24, 0 }
  0x1b   : > { %v458_v31 = vmul.f32 %v457_v27, %v454_v26  ;;  %vm561_vm12 = vweird.f32 %v936_v24 }
  0x1c   : > { %v473_v32 = vshrl.u32 %v472_v28, 23  ;;  %v476_v36 = vand.u32 8388607, %v469_v30  ;;  %vm470_vm8 = vcmp.le.f32.partialorder %v469_v30, 0.7853982 }
  0x1d   : > { %v460_v33 = vsub.f32 %v459_v29, %v458_v31  ;;  %v464_v34 = vadd.f32 1.0, %v458_v31 }
  0x1e   : > { %v774_v35 = vadd.s32 4294967169, %v473_v32  ;;  %v477_v39 = vor.u32 8388608, %v476_v36 }
  0x1f   : > { %v461_v37 = vadd.f32 1.0, %v460_v33  ;;  %824 = vlog2.f32 %v464_v34 }
  0x20   : > { %v479_v38 = vadd.s32 1, %v774_v35  ;;  %v517_v54 = vshll.u32 %v477_v39, 8 }
  0x21   : > { %826 = vlog2.f32 %v461_v37 }
  0x22   : > { %vm480_vm0 = vcmp.gt.s32.totalorder %v479_v38, 0 }
  0x23   : > { %v481_v40 = vsel %vm480_vm0, %v479_v38, 0 }
  0x24   : > { %v483_v41 = vand.u32 31, %v481_v40  ;;  %v482_v42 = vshrl.u32 %v481_v40, 5 }
  0x26   : > { %v484_v43 = vsub.s32 32, %v483_v41  ;;  %v486_v45 = vshll.u32 %v856_v44, %v483_v41  ;;  %v489_v47 = vshll.u32 %v857_v46, %v483_v41  ;;  %v492_v49 = vshll.u32 %v858_v48, %v483_v41 }
  0x27   : > { %v495_v51 = vshll.u32 %v859_v50, %v483_v41  ;;  %v498_v53 = vshll.u32 %v860_v52, %v483_v41  ;;  %vm501_vm1 = vcmp.lt.s32.totalorder %v482_v42, 1  ;;  %vm502_vm2 = vcmp.lt.s32.totalorder %v482_v42, 2 }
  0x28   : > { %v485_v55 = vshrl.u32 %v856_v44, %v484_v43  ;;  %v487_v56 = vshrl.u32 %v857_v46, %v484_v43  ;;  %v490_v57 = vshrl.u32 %v858_v48, %v484_v43  ;;  %v493_v58 = vshrl.u32 %v859_v50, %v484_v43 }
  0x29   : > { %v496_v59 = vshrl.u32 %v860_v52, %v484_v43  ;;  %v499_v61 = vshrl.u32 %v861_v60, %v484_v43  ;;  %v825_v62 = vpop.eup %824  ;;  %vm504_vm3 = vcmp.lt.s32.totalorder %v482_v42, 4  ;;  %vm503_vm4 = vcmp.lt.s32.totalorder %v482_v42, 3 }
  0x2a   : > { %v488_v63 = vor.u32 %v487_v56, %v486_v45  ;;  %v491_v1 = vor.u32 %v490_v57, %v489_v47  ;;  %v494_v2 = vor.u32 %v493_v58, %v492_v49  ;;  %v466_v3 = vmul.f32 0.6931472, %v825_v62 }
  0x2b   : > { %v497_v4 = vor.u32 %v496_v59, %v495_v51  ;;  %v500_v5 = vor.u32 %v499_v61, %v498_v53  ;;  %v827_v6 = vpop.eup %826 }
  0x2c   : > { %v505_v7 = vsel %vm501_vm1, %v485_v55, %v488_v63  ;;  %v506_v8 = vsel %vm504_vm3, %v494_v2, 2102212464  ;;  %v509_v9 = vsel %vm501_vm1, %v488_v63, %v491_v1  ;;  %v513_v10 = vsel %vm501_vm1, %v491_v1, %v494_v2 }
  0x2d   : > { %v463_v11 = vmul.f32 0.6931472, %v827_v6  ;;  %v507_v12 = vsel %vm503_vm4, %v491_v1, %v506_v8  ;;  %v510_v13 = vsel %vm504_vm3, %v497_v4, 920167782  ;;  %v514_v14 = vsel %vm504_vm3, %v500_v5, 1326507024 }
  0x2e   : > { %v511_v15 = vsel %vm503_vm4, %v494_v2, %v510_v13  ;;  %v515_v16 = vsel %vm503_vm4, %v497_v4, %v514_v14  ;;  %v508_v18 = vsel %vm502_vm2, %v505_v7, %v507_v12 }
  0x2f   : > { %v467_v17 = vsub.f32 %v463_v11, %v466_v3  ;;  %v512_v19 = vsel %vm502_vm2, %v509_v9, %v511_v15  ;;  %v516_v20 = vsel %vm502_vm2, %v513_v10, %v515_v16  ;;  %v524_v27 = vmul.u32 %v517_v54, %v508_v18 }
  0x30   : > { %v946_v21 = vmul.u32.u64.low %v517_v54, %v516_v20  ;;  %v947_v22 = vmul.u32.u64.high %v517_v54, %v516_v20, %v946_v21  ;;  %v949_v23 = vmul.u32.u64.low %v517_v54, %v512_v19  ;;  %v950_v25 = vmul.u32.u64.high %v517_v54, %v512_v19, %v949_v23 }
  0x31   : > { %v577_v26 = vmul.f32 %v467_v17, %v921_v0 }
  0x32   : > { %vm526_vm5 = vc.u32 %v947_v22, %v949_v23  ;;  %v527_v28 = vadd.s32 1, %v950_v25  ;;  %v525_v40 = vadd.s32 %v949_v23, %v947_v22 }
  0x33   : > { %783 = vst [vmem:[%s919_s7 + $0x18] sm:$0xff] %v577_v26 }
  0x34   : > { %v528_v29 = vsel %vm526_vm5, %v527_v28, %v950_v25 }
  0x35   : > { %v529_v31 = vadd.s32 %v528_v29, %v524_v27 }
  0x37   : > { %v530_v32 = vadd.s32 536870912, %v529_v31 }
  0x39   : > { %v531_v33 = vshrl.u32 %v530_v32, 30 }
  0x3b   : > { %v532_v34 = vshll.u32 %v531_v33, 30  ;;  %v555_v54 = vsub.s32 4, %v531_v33 }
  0x3d   : > { %v533_v35 = vsub.s32 %v529_v31, %v532_v34  ;;  %v556_v57 = vsel %vm471_vm7, %v555_v54, %v531_v33 }
  0x3e   : > { %v558_v58 = vsel %vm470_vm8, 0, %v556_v57 }
  0x3f   : > { %v535_v36 = vsub.s32 0, %v533_v35  ;;  %v562_v59 = vand.u32 3, %v558_v58 }
  0x41   : > { %v775_v37 = vmin.u32 %v535_v36, %v533_v35  ;;  %vm567_vm9 = vcmp.eq.s32.totalorder %v562_v59, 2  ;;  %vm564_vm10 = vcmp.eq.s32.totalorder %v562_v59, 0  ;;  %vm563_vm11 = vcmp.lt.s32.totalorder %v562_v59, 2 }
  0x43   : > { %v537_v38 = vclz %v775_v37 }
  0x45   : > { %v776_v39 = vadd.s32 4294967294, %v537_v38 }
  0x47   : > { %vm777_vm6 = vcmp.lt.s32.totalorder %v776_v39, 0 }
  0x48   : > { %v540_v41 = vsel %vm777_vm6, 0, %v776_v39 }
  0x49   : > { %v541_v42 = vsub.s32 32, %v540_v41  ;;  %v542_v43 = vshll.u32 %v533_v35, %v540_v41  ;;  %v545_v44 = vsub.s32 4294967266, %v540_v41 }
  0x4b   : > { %v543_v45 = vshrl.u32 %v525_v40, %v541_v42  ;;  %v546_v46 = vadd.s32 127, %v545_v44 }
  0x4d   : > { %v544_v47 = vor.u32 %v543_v45, %v542_v43  ;;  %v547_v48 = vshll.u32 %v546_v46, 23 }
  0x4f   : > { %v548_v49 = vor.u32 4788187, %v547_v48  ;;  %v551_v50 = vcvt.s32.f32 %v544_v47 }
  0x51   : > { %v549_v51 = vand.u32 2147483647, %v548_v49 }
  0x53   : > { %v552_v52 = vmul.f32 %v551_v50, %v549_v51 }
  0x55   : > { %v553_v53 = vxor.u32 2147483648, %v552_v52 }
  0x57   : > { %v554_v55 = vsel %vm471_vm7, %v553_v53, %v552_v52 }
  0x58   : > { %v557_v56 = vsel %vm470_vm8, %v936_v24, %v554_v55 }
  0x59   : > { %828 = vcosq.f32 %v557_v56 }
  0x5a   : > { %830 = vsinq.f32 %v557_v56 }
  0x63   : > { %v829_v60 = vpop.eup %828 }
  0x64   : > { %v831_v61 = vpop.eup %830  ;;  %v568_v62 = vxor.u32 2147483648, %v829_v60 }
  0x65   : > { %v565_v63 = vxor.u32 2147483648, %v831_v61 }
  0x66   : > { %v569_v30 = vsel %vm567_vm9, %v568_v62, %v831_v61 }
  0x67   : > { %v566_v1 = vsel %vm564_vm10, %v829_v60, %v565_v63 }
  0x68   : > { %v570_v2 = vsel %vm563_vm11, %v566_v1, %v569_v30 }
  0x69   : > { %v571_v3 = vsel %vm561_vm12, nan, %v570_v2 }
  0x6a   : > { %v572_v4 = vsub.f32 1.0, %v571_v3 }
  0x6c   : > { %v579_v5 = vmul.f32 %v572_v4, %v921_v0 }
  0x6e   : > { %785 = vst [vmem:[%s919_s7 + $0x20] sm:$0xff] %v579_v5 }
  0x6f PF: > { %s15_s20 = sadd.s32 1, %s854_s20   ;;  %s980_s18 = smov %s850_s19 }
  0x70   : > { %p12_p5 = scmp.ge.s32.totalorder %s15_s20, 4   ;;  %s981_s19 = smov %s983_s21 }
  0x72   :  { %14 = sbr.rel (!%p12_p5) target bundleno = 2 (0x2), region = 98 }

</bundles_post_ra>
